<compile_context>
chip_gen: v6e
topology: v6e:2x2x1
jax: 0.10.0
libtpu: 0.0.40
codegen_flags: <defaults>
</compile_context>

<pallas_src>
import jax
import jax.numpy as jnp
from jax.experimental import pallas as pl
from jax.experimental.pallas import tpu as pltpu


def _round_up(n: int, m: int) -> int:
    return ((n + m - 1) // m) * m


# ---------------------------------------------------------------------------
# Kernel: one batch tile of the whole MLP. Weights/biases are VMEM-resident
# across the batch grid (their index_map always returns block (0, 0)).
# ---------------------------------------------------------------------------
def _cell_kernel(x_ref, w1_ref, b1_ref, w2_ref, b2_ref, out_ref):
    # Cast x to the matmul operand dtype inside the kernel (free VPU work
    # hidden under DMA; a no-op on the f32 path).  Avoids a standalone XLA
    # cast pass over x in the wrapper.
    x = x_ref[...].astype(w1_ref.dtype)
    # First linear: [TB, I] @ [I, Hp] -> f32 accumulator on the MXU.
    h = jnp.dot(x, w1_ref[...], preferred_element_type=jnp.float32)
    # Bias + ReLU in f32 (MXU result is already f32; v5e-safe).
    h = jnp.maximum(h + b1_ref[...], 0.0)
    # Second linear: [TB, Hp] @ [Hp, O] -> f32 accumulator.
    h = h.astype(w2_ref.dtype)
    o = jnp.dot(h, w2_ref[...], preferred_element_type=jnp.float32)
    out_ref[...] = (o + b2_ref[...]).astype(out_ref.dtype)


# ---------------------------------------------------------------------------
# One-time parameter preparation (hoisted out of the forward path).
# Takes PyTorch-layout weights ([out, in]) and returns kernel-ready operands:
# transposed, hidden dim zero-padded to a lane multiple, optional bf16 cast.
# The output width is kept un-padded (see out_specs note above).
# ---------------------------------------------------------------------------
def prepare_cell_params(w1, b1, w2, b2, compute_dtype=jnp.float32):
    H, I = w1.shape
    O = w2.shape[0]
    Hp = _round_up(H, 128)

    w1_t = jnp.zeros((I, Hp), jnp.float32).at[:, :H].set(jnp.asarray(w1, jnp.float32).T)
    b1_r = jnp.zeros((1, Hp), jnp.float32).at[:, :H].set(jnp.asarray(b1, jnp.float32))
    w2_t = jnp.zeros((Hp, O), jnp.float32).at[:H, :].set(jnp.asarray(w2, jnp.float32).T)
    b2_r = jnp.asarray(b2, jnp.float32).reshape(1, O)

    # Matmul operands in compute_dtype (bf16 on v6e/v7x halves weight traffic);
    # biases stay f32 since the elementwise tail runs in f32.
    return w1_t.astype(compute_dtype), b1_r, w2_t.astype(compute_dtype), b2_r


def _choose_batch_tile(B: int, sublane: int) -> int:
    """Batch tile: >=2 grid steps when possible (v7x megacore), tiles up to
    4096 rows at large B, padding waste bounded by one tile's round-up."""
    if B <= 2 * sublane:
        return _round_up(B, sublane)
    n_steps = max(2, -(-B // 4096))          # ceil(B / 4096), at least 2
    return _round_up(-(-B // n_steps), sublane)


# ---------------------------------------------------------------------------
# Jitted forward wrapper: pads the batch to the tile size, launches the
# batch-tiled Pallas kernel, and slices back to the logical [B, O] output.
# ---------------------------------------------------------------------------
@jax.jit
def cell_forward(x, w1_t, b1_r, w2_t, b2_r):
    B, I = x.shape
    Hp = w1_t.shape[1]
    O = w2_t.shape[1]

    # bf16 packs 16 sublanes per vreg -> use 16-row granularity on that path.
    sublane = 16 if w1_t.dtype == jnp.bfloat16 else 8
    TB = _choose_batch_tile(B, sublane)
    Bp = _round_up(B, TB)

    xp = x if Bp == B else jnp.pad(x, ((0, Bp - B), (0, 0)))

    # Scoped-VMEM estimate (double-buffered x/out tiles + resident weights);
    # only raise the limit when we'd brush v5e's 16 MiB default.
    itemsize_x = jnp.dtype(x.dtype).itemsize
    itemsize_w = jnp.dtype(w1_t.dtype).itemsize
    vmem_est = 2 * (TB * I * itemsize_x + TB * O * 4
                    + (I * Hp + Hp * O) * itemsize_w + (Hp + O) * 4)
    vmem_limit = None
    if vmem_est > 12 * (1 << 20):
        vmem_limit = min(int(vmem_est * 3 // 2), 64 * (1 << 20))

    out = pl.pallas_call(
        _cell_kernel,
        out_shape=jax.ShapeDtypeStruct((Bp, O), jnp.float32),
        grid_spec=pl.GridSpec(
            grid=(Bp // TB,),
            in_specs=[
                pl.BlockSpec((TB, I), lambda i: (i, 0)),   # x: batch-tiled
                pl.BlockSpec((I, Hp), lambda i: (0, 0)),   # w1: VMEM-resident
                pl.BlockSpec((1, Hp), lambda i: (0, 0)),   # b1: VMEM-resident
                pl.BlockSpec((Hp, O), lambda i: (0, 0)),   # w2: VMEM-resident
                pl.BlockSpec((1, O), lambda i: (0, 0)),    # b2: VMEM-resident
            ],
            out_specs=pl.BlockSpec((TB, O), lambda i: (i, 0)),
        ),
        compiler_params=pltpu.CompilerParams(
            # Batch axis is independent -> parallel (shards across both
            # TensorCores on v7x; harmless on single-TC v5e/v6e).
            dimension_semantics=("parallel",),
            vmem_limit_bytes=vmem_limit,
        ),
    )(xp, w1_t, b1_r, w2_t, b2_r)

    return out if Bp == B else out[:B]


def _init_linear(key, out_features, in_features):
    """Deterministic PyTorch-like uniform init: U(-1/sqrt(fan_in), 1/sqrt(fan_in))."""
    kw, kb = jax.random.split(key)
    bound = 1.0 / jnp.sqrt(jnp.float32(in_features))
    w = jax.random.uniform(kw, (out_features, in_features), jnp.float32,
                           minval=-bound, maxval=bound)
    b = jax.random.uniform(kb, (out_features,), jnp.float32,
                           minval=-bound, maxval=bound)
    return w, b


if __name__ == "__main__":
    # Small, module-consistent shapes.
    batch, input_size, hidden_size, output_size = 8, 32, 64, 16

    key = jax.random.PRNGKey(0)
    kx, k1, k2 = jax.random.split(key, 3)

    x = jax.random.normal(kx, (batch, input_size), jnp.float32)
    w1, b1 = _init_linear(k1, hidden_size, input_size)
    w2, b2 = _init_linear(k2, output_size, hidden_size)

    # Plain-JAX reference (matches the PyTorch module's f32 forward).
    def ref_fn(xx):
        return jnp.maximum(xx @ w1.T + b1, 0.0) @ w2.T + b2

    ref = ref_fn(x)

    # --- f32 path: exact module semantics, tight tolerance ------------------
    p_f32 = prepare_cell_params(w1, b1, w2, b2, compute_dtype=jnp.float32)
    out = jax.block_until_ready(cell_forward(x, *p_f32))
    assert out.shape == (batch, output_size)
    assert jnp.allclose(out, ref, atol=1e-5, rtol=1e-5)

    # --- bf16 matmul-operand path (v6e/v7x MXU rate), f32 accumulate + tail -
    p_bf16 = prepare_cell_params(w1, b1, w2, b2, compute_dtype=jnp.bfloat16)
    out_bf16 = jax.block_until_ready(cell_forward(x, *p_bf16))
    assert out_bf16.shape == (batch, output_size)
    assert jnp.allclose(out_bf16, ref, atol=5e-2, rtol=5e-2)

    # --- odd batch: exercises batch padding + a >=2-step grid (megacore) ----
    x_big = jax.random.normal(kx, (300, input_size), jnp.float32)
    out_big = jax.block_until_ready(cell_forward(x_big, *p_f32))
    assert out_big.shape == (300, output_size)
    assert jnp.allclose(out_big, ref_fn(x_big), atol=1e-5, rtol=1e-5)

    # TODO(synk): `self.energy = 100` is non-tensor Python state unused by
    # forward(); it has no kernel equivalent and is intentionally omitted.
    print("KERNEL_OK")
</pallas_src>

<mosaic_0001>
module attributes {stable_mosaic.version = 11 : i64} {
  func.func @_cell_kernel(%arg0: i32, %arg1: memref<8x32xf32, #tpu.memory_space<vmem>>, %arg2: memref<32x128xf32, #tpu.memory_space<vmem>>, %arg3: memref<1x128xf32, #tpu.memory_space<vmem>>, %arg4: memref<128x16xf32, #tpu.memory_space<vmem>>, %arg5: memref<1x16xf32, #tpu.memory_space<vmem>>, %arg6: memref<8x16xf32, #tpu.memory_space<vmem>>) attributes {dimension_semantics = [#tpu.dimension_semantics<parallel>], iteration_bounds = array<i64: 1>, scalar_prefetch = 0 : i64, scratch_operands = 0 : i64, tpu.core_type = #tpu.core_type<tc>, window_params = [{transform_indices = @transform_0, window_bounds = array<i64: 8, 32>}, {pipeline_mode = #tpu.pipeline_mode<synchronous>, transform_indices = @transform_1, window_bounds = array<i64: 32, 128>}, {pipeline_mode = #tpu.pipeline_mode<synchronous>, transform_indices = @transform_2, window_bounds = array<i64: 1, 128>}, {pipeline_mode = #tpu.pipeline_mode<synchronous>, transform_indices = @transform_3, window_bounds = array<i64: 128, 16>}, {pipeline_mode = #tpu.pipeline_mode<synchronous>, transform_indices = @transform_4, window_bounds = array<i64: 1, 16>}, {transform_indices = @transform_5, window_bounds = array<i64: 8, 16>}]} {
    %c0 = arith.constant 0 : index
    %c0_0 = arith.constant 0 : index
    %0 = vector.load %arg1[%c0, %c0_0] : memref<8x32xf32, #tpu.memory_space<vmem>>, vector<8x32xf32>
    %c0_1 = arith.constant 0 : index
    %c0_2 = arith.constant 0 : index
    %1 = vector.load %arg2[%c0_1, %c0_2] : memref<32x128xf32, #tpu.memory_space<vmem>>, vector<32x128xf32>
    %cst = arith.constant dense<0.000000e+00> : vector<8x128xf32>
    %2 = tpu.matmul %0, %1, %cst {dimension_numbers = #tpu.dot_dimension_numbers<[1], [0], [0], [1], [0, 0, 1, 1], [], []>} : vector<8x32xf32>, vector<32x128xf32>, vector<8x128xf32> -> vector<8x128xf32>
    %c0_3 = arith.constant 0 : index
    %c0_4 = arith.constant 0 : index
    %3 = vector.load %arg3[%c0_3, %c0_4] : memref<1x128xf32, #tpu.memory_space<vmem>>, vector<1x128xf32>
    %4 = vector.broadcast %3 : vector<1x128xf32> to vector<8x128xf32>
    %5 = arith.addf %2, %4 : vector<8x128xf32>
    %cst_5 = arith.constant 0.000000e+00 : f32
    %6 = vector.broadcast %cst_5 : f32 to vector<8x128xf32>
    %7 = arith.maximumf %5, %6 : vector<8x128xf32>
    %c0_6 = arith.constant 0 : index
    %c0_7 = arith.constant 0 : index
    %8 = vector.load %arg4[%c0_6, %c0_7] : memref<128x16xf32, #tpu.memory_space<vmem>>, vector<128x16xf32>
    %cst_8 = arith.constant dense<0.000000e+00> : vector<8x16xf32>
    %9 = tpu.matmul %7, %8, %cst_8 {dimension_numbers = #tpu.dot_dimension_numbers<[1], [0], [0], [1], [0, 0, 1, 1], [], []>} : vector<8x128xf32>, vector<128x16xf32>, vector<8x16xf32> -> vector<8x16xf32>
    %c0_9 = arith.constant 0 : index
    %c0_10 = arith.constant 0 : index
    %10 = vector.load %arg5[%c0_9, %c0_10] : memref<1x16xf32, #tpu.memory_space<vmem>>, vector<1x16xf32>
    %11 = vector.broadcast %10 : vector<1x16xf32> to vector<8x16xf32>
    %12 = arith.addf %9, %11 : vector<8x16xf32>
    %c0_11 = arith.constant 0 : index
    %c0_12 = arith.constant 0 : index
    %13 = vector.load %arg6[%c0_11, %c0_12] : memref<8x16xf32, #tpu.memory_space<vmem>>, vector<8x16xf32>
    tpu.vector_store %arg6[%c0_11, %c0_12], %12 {strides = array<i32>} : memref<8x16xf32, #tpu.memory_space<vmem>>, vector<8x16xf32>,
    return
  }
  func.func @transform_0(%arg0: i32) -> (i32, i32) {
    %c0_i32 = arith.constant 0 : i32
    %c0_i32_0 = arith.constant 0 : i32
    return %arg0, %c0_i32 : i32, i32
  }
  func.func @transform_1(%arg0: i32) -> (i32, i32) {
    %c0_i32 = arith.constant 0 : i32
    %c0_i32_0 = arith.constant 0 : i32
    %c0_i32_1 = arith.constant 0 : i32
    return %c0_i32, %c0_i32_0 : i32, i32
  }
  func.func @transform_2(%arg0: i32) -> (i32, i32) {
    %c0_i32 = arith.constant 0 : i32
    %c0_i32_0 = arith.constant 0 : i32
    %c0_i32_1 = arith.constant 0 : i32
    return %c0_i32, %c0_i32_0 : i32, i32
  }
  func.func @transform_3(%arg0: i32) -> (i32, i32) {
    %c0_i32 = arith.constant 0 : i32
    %c0_i32_0 = arith.constant 0 : i32
    %c0_i32_1 = arith.constant 0 : i32
    return %c0_i32, %c0_i32_0 : i32, i32
  }
  func.func @transform_4(%arg0: i32) -> (i32, i32) {
    %c0_i32 = arith.constant 0 : i32
    %c0_i32_0 = arith.constant 0 : i32
    %c0_i32_1 = arith.constant 0 : i32
    return %c0_i32, %c0_i32_0 : i32, i32
  }
  func.func @transform_5(%arg0: i32) -> (i32, i32) {
    %c0_i32 = arith.constant 0 : i32
    %c0_i32_0 = arith.constant 0 : i32
    return %arg0, %c0_i32 : i32, i32
  }
}

</mosaic_0001>

<bundles_post_ra>
// kernel: cell_forward.1
= control target key start
LH: loop header
LB: loop body
LE: loop exit
PB: predicated region body
PF: predicated region fallthrough
CT: control target
= control target key end

     0   :  { %v313_v1 = vmov 0.0   ;;  %vm314_vm0 = vmmov 0   ;;  %vm33_vm1 = vcmask 261120   ;;  %s442_s0 = inlined_call_operand.vmem [shape: f32[8,32], index: 0, kind: input, shape index: {}]   ;;  %s443_s1 = inlined_call_operand.vmem [shape: f32[32,128], index: 1, kind: input, shape index: {}]   ;;  %s444_s2 = inlined_call_operand.vmem [shape: f32[1,128], index: 2, kind: input, shape index: {}]   ;;  %s445_s3 = inlined_call_operand.vmem [shape: f32[128,16], index: 3, kind: input, shape index: {}]   ;;  %s446_s4 = inlined_call_operand.vmem [shape: f32[1,16], index: 4, kind: input, shape index: {}]   ;;  %s447_s5 = inlined_call_operand.hbm [shape: f32[8,16], index: 5, kind: output, shape index: {}]  }
   0x1   :  { %v25_v0 = vld [vmem:[%s443_s1 + $0x18] sm:$0xff]  ;;  %242 = vmatprep.subr.mxu0 %v313_v1  ;;  %v24_v2 = vld [vmem:[%s443_s1 + $0x10] sm:$0xff]  ;;  %250 = vmatprep.mubr.msk.f32.mxu0 %vm314_vm0, %v313_v1  ;;  %v23_v5 = vld [vmem:[%s443_s1 + $0x8] sm:$0xff] }
   0x2   :  { %v123_v3 = vld [vmem:[%s445_s3 + $0x78] sm:$0xff]  ;;  %243 = vmatpush3.msra.mxu0 %v25_v0  ;;  %253 = vmatprep.subr.mxu1 %v313_v1  ;;  %v122_v4 = vld [vmem:[%s445_s3 + $0x70] sm:$0xff]  ;;  %v121_v6 = vld [vmem:[%s445_s3 + $0x68] sm:$0xff] }
   0x3   :  { %244 = vmatprep.subr.mxu0 %v313_v1  ;;  %254 = vmatpush3.msra.mxu1 %v123_v3  ;;  %v22_v7 = vld [vmem:[%s443_s1] sm:$0xff] }
   0x4   :  { %245 = vmatpush3.msra.mxu0 %v24_v2  ;;  %255 = vmatprep.subr.mxu1 %v313_v1  ;;  %v21_v8 = vld [vmem:[%s442_s0] sm:$0xff] }
   0x5   :  { %246 = vmatprep.subr.mxu0 %v313_v1  ;;  %256 = vmatpush3.msra.mxu1 %v122_v4  ;;  %v120_v9 = vld [vmem:[%s445_s3 + $0x60] sm:$0xff] }
   0x6   :  { %247 = vmatpush3.msra.mxu0 %v23_v5  ;;  %257 = vmatprep.subr.mxu1 %v313_v1 }
   0x7   :  { %10 = vsyncpa [#allocation3], 0  ;;  %248 = vmatprep.subr.mxu0 %v313_v1  ;;  %258 = vmatpush3.msra.mxu1 %v121_v6  ;;  %v119_v10 = vld [vmem:[%s445_s3 + $0x58] sm:$0xff]  ;;  %v118_v11 = vld [vmem:[%s445_s3 + $0x50] sm:$0xff]  ;;  %s315_s11 = smov [#allocation2]   ;;  %vm201_vm2 = vcmask 130048  }
   0x8   :  { %249 = vmatpush3.msra.mxu0 %v22_v7  ;;  %259 = vmatprep.subr.mxu1 %v313_v1  ;;  %v117_v12 = vld [vmem:[%s445_s3 + $0x48] sm:$0xff]  ;;  %v116_v13 = vld [vmem:[%s445_s3 + $0x40] sm:$0xff]  ;;  %v115_v14 = vld [vmem:[%s445_s3 + $0x38] sm:$0xff]  ;;  %s209_s0 = sshll.u32 %s315_s11, 4  ;;  %s210_s0 = int_to_ptr.vmem [resolvable:$true] %s209_s0 }
   0x9   :  { %251 = vmatmul.mubr.msk.f32.vlgmr.msra.gmra.mxu0 %vm33_vm1, %v21_v8  ;;  %260 = vmatpush3.msra.mxu1 %v120_v9  ;;  %v114_v15 = vld [vmem:[%s445_s3 + $0x30] sm:$0xff]  ;;  %v113_v16 = vld [vmem:[%s445_s3 + $0x28] sm:$0xff]  ;;  %v112_v17 = vld [vmem:[%s445_s3 + $0x20] sm:$0xff]  ;;  %p296_p1 = scmp.lt.s32.totalorder %s210_s0, %s210_s0 }
   0xa   :  { %261 = vmatprep.subr.mxu1 %v313_v1  ;;  %285 = vmatprep.mubr.msk.f32.mxu1 %vm314_vm0, %v313_v1  ;;  %v111_v18 = vld [vmem:[%s445_s3 + $0x18] sm:$0xff]  ;;  %v110_v19 = vld [vmem:[%s445_s3 + $0x10] sm:$0xff]  ;;  %v109_v20 = vld [vmem:[%s445_s3 + $0x8] sm:$0xff] }
   0xb   :  { %262 = vmatpush3.msra.mxu1 %v119_v10  ;;  %v108_v21 = vld [vmem:[%s445_s3] sm:$0xff]  ;;  %s291_s3 = scalar_lea.vmem %s210_s0, 128 }
   0xc   :  { %263 = vmatprep.subr.mxu1 %v313_v1  ;;  %v217_v22 = vld [vmem:[%s444_s2] ss:$0 sm:$0xff]  ;;  %p292_p0 = scmp.ne.s32.totalorder %s210_s0, %s291_s3  ;;  %p297_p2 = scmp.lt.s32.totalorder %s291_s3, %s291_s3 }
   0xd   :  { %264 = vmatpush3.msra.mxu1 %v118_v11  ;;  %v219_v27 = vld [vmem:[%s446_s4] ss:$0 sm:$0xff] }
   0xe   :  { %265 = vmatprep.subr.mxu1 %v313_v1  ;;  %p298_p3 = por %p297_p2, %p296_p1 }
   0xf   :  { %266 = vmatpush3.msra.mxu1 %v117_v12 }
  0x10   :  { %267 = vmatprep.subr.mxu1 %v313_v1  ;;  %p299_p4 = pnand %p298_p3, %p292_p0 }
  0x11   :  { %268 = vmatpush3.msra.mxu1 %v116_v13 }
  0x12   :  { %269 = vmatprep.subr.mxu1 %v313_v1 }
  0x13   :  { %270 = vmatpush3.msra.mxu1 %v115_v14 }
  0x14   :  { %271 = vmatprep.subr.mxu1 %v313_v1 }
  0x15   :  { %272 = vmatpush3.msra.mxu1 %v114_v15 }
  0x16   :  { %273 = vmatprep.subr.mxu1 %v313_v1 }
  0x17   :  { %274 = vmatpush3.msra.mxu1 %v113_v16 }
  0x18   :  { %275 = vmatprep.subr.mxu1 %v313_v1 }
  0x19   :  { %276 = vmatpush3.msra.mxu1 %v112_v17 }
  0x1a   :  { %277 = vmatprep.subr.mxu1 %v313_v1 }
  0x1b   :  { %278 = vmatpush3.msra.mxu1 %v111_v18 }
  0x1c   :  { %279 = vmatprep.subr.mxu1 %v313_v1 }
  0x1d   :  { %280 = vmatpush3.msra.mxu1 %v110_v19 }
  0x1e   :  { %281 = vmatprep.subr.mxu1 %v313_v1 }
  0x1f   :  { %282 = vmatpush3.msra.mxu1 %v109_v20 }
  0x20   :  { %283 = vmatprep.subr.mxu1 %v313_v1 }
  0x21   :  { %284 = vmatpush3.msra.mxu1 %v108_v21 }
  0xc9   :  { %v103_v23 = vpop.f32.mrf.mxu0 }
  0xca   :  { %v104_v24 = vadd.f32 %v217_v22, %v103_v23 }
  0xcb   :  { %v252_v25 = vpop.f32.mrf.mxu0 }
  0xcc   :  { %v107_v26 = vmax.f32 %v104_v24, 0.0 }
  0xce   :  { %286 = vmatmul.mubr.f32.vlgmr.msra.gmra.mxu1 %v107_v26 }
 0x18e   :  { %v197_v28 = vpop.f32.mrf.mxu1 }
 0x18f   :  { %v198_v29 = vadd.f32 %v219_v27, %v197_v28 }
 0x190   :  { %v287_v30 = vpop.f32.mrf.mxu1 }
 0x191   :  { %202 = vst.msk [vmem:[#allocation2] sm:$0xff] %vm201_vm2, %v198_v29 }
 0x192   :  { %302 = shalt.err (!%p299_p4)
}
 0x193   :  { %212 = dma.vmem_to_hbm [thread:$0]  %s210_s0, 128, %s447_s5, [#allocation3]  }
 0x194   :  { %311 = dma.done.wait [#allocation3], 128  }
 0x195   :  { %312 = vsyncadd [#allocation3], 4294967168 }
 0x196   :  { %216 = vsyncpa [#allocation3], 1 }

</bundles_post_ra>
